<compile_context>
chip_gen: v5e
topology: v5e:2x2
jax: 0.10.0
libtpu: 0.0.40
codegen_flags: <defaults>
</compile_context>

<pallas_src>
import functools
import math

import jax
import jax.numpy as jnp
from jax import lax
from jax.experimental import pallas as pl
from jax.experimental.pallas import tpu as pltpu

_BN_EPS = 1e-5      # PyTorch BatchNorm1d default eps
_CONV_PAD = 1       # nn.Conv1d(padding=1)
_POOL_PAD = 1       # nn.MaxPool1d(padding=1)


# ----------------------------- in-kernel helpers -----------------------------

def _maxpool_padded_ref(ref, k, stride, n_out):
    """Max-pool from a zero-padded (TB, Lpad, C) VMEM scratch ref.

    The ref holds post-ReLU data (>= 0) with zero border rows, so zero padding is
    equivalent to PyTorch's -inf MaxPool1d padding.  Each tap is one (strided)
    sublane read; the pool is an elementwise max of k views (no concatenation).
    """
    def tap(j):
        if stride == 1:
            return ref[:, j:j + n_out, :]
        return ref[:, pl.ds(j, n_out, stride), :]

    m = tap(0)
    for j in range(1, k):
        m = jnp.maximum(m, tap(j))
    return m


# --------------------------------- the kernel --------------------------------

def _cnn1d_kernel(x_ref, w1_ref, b1_ref, w2_ref, b2_ref, fcw_ref, fcb_ref,
                  out_ref, s1_ref, s2_ref, s3_ref, *,
                  pool_k, stride_1, stride):
    TB, Lc, Cin = x_ref.shape           # x is pre-padded in the wrapper: Lc = L + 2
    L = Lc - 2 * _CONV_PAD
    K, _, C1 = w1_ref.shape
    C2 = w2_ref.shape[2]
    Lp1 = s2_ref.shape[1] - 2 * _CONV_PAD
    Lp2 = fcw_ref.shape[0]

    x = x_ref[...].astype(jnp.float32)                      # (TB, L+2, Cin)
    w1 = w1_ref[...]                                        # (K, Cin, C1) f32

    # ---- Conv1 (BN folded) + ReLU -------------------------------------------
    if Cin == 1:
        # degenerate contraction dim -> broadcast multiply-add on the VPU (f32)
        h = x[:, 0:L, :] * w1[0][None]
        for j in range(1, K):
            h = h + x[:, j:j + L, :] * w1[j][None]
    else:
        acc = jnp.zeros((TB * L, C1), jnp.float32)
        for j in range(K):
            xj = x[:, j:j + L, :].reshape(TB * L, Cin).astype(jnp.bfloat16)
            acc = acc + jnp.dot(xj, w1[j].astype(jnp.bfloat16),
                                preferred_element_type=jnp.float32)
        h = acc.reshape(TB, L, C1)
    h = jnp.maximum(h + b1_ref[...][None], 0.0)             # (TB, L, C1)

    # zero-bordered copy in VMEM scratch: serves both as the -inf-equivalent
    # pool padding (post-ReLU) and as Conv1d's zero padding for the next stage.
    zero_c1 = jnp.zeros((TB, 1, C1), jnp.float32)
    s1_ref[:, 0:1, :] = zero_c1
    s1_ref[:, L + 1:L + 2, :] = zero_c1
    s1_ref[:, 1:L + 1, :] = h

    # ---- MaxPool1d(k=pool_k, stride=stride_1, pad=1) -------------------------
    p1 = _maxpool_padded_ref(s1_ref, pool_k, stride_1, Lp1)  # (TB, Lp1, C1)

    s2_ref[:, 0:1, :] = zero_c1
    s2_ref[:, Lp1 + 1:Lp1 + 2, :] = zero_c1
    s2_ref[:, 1:Lp1 + 1, :] = p1

    # ---- Conv2 (BN folded) + ReLU: one MXU dot per tap, bf16 in / f32 acc ----
    acc2 = jnp.zeros((TB * Lp1, C2), jnp.float32)
    for j in range(K):
        vj = s2_ref[:, j:j + Lp1, :].reshape(TB * Lp1, C1).astype(jnp.bfloat16)
        acc2 = acc2 + jnp.dot(vj, w2_ref[j], preferred_element_type=jnp.float32)
    h2 = jnp.maximum(acc2 + b2_ref[...], 0.0).reshape(TB, Lp1, C2)

    zero_c2 = jnp.zeros((TB, 1, C2), jnp.float32)
    s3_ref[:, 0:1, :] = zero_c2
    s3_ref[:, Lp1 + 1:Lp1 + 2, :] = zero_c2
    s3_ref[:, 1:Lp1 + 1, :] = h2

    # ---- MaxPool1d(k=pool_k, stride=stride, pad=1) ---------------------------
    p2 = _maxpool_padded_ref(s3_ref, pool_k, stride, Lp2)    # (TB, Lp2, C2)

    # dropout: eval-mode identity.
    # TODO(synk): train-mode dropout (PyTorch RNG mask) not reproduced.

    # ---- flatten + Linear.  fcw_ref is (Lp2, C2, OUT_PAD), pre-permuted so the
    # per-position accumulation matches PyTorch's channel-major flatten exactly.
    acc_o = jnp.zeros((TB, out_ref.shape[1]), jnp.float32)
    for l in range(Lp2):
        acc_o = acc_o + jnp.dot(p2[:, l, :].astype(jnp.bfloat16), fcw_ref[l],
                                preferred_element_type=jnp.float32)
    out_ref[...] = (acc_o + fcb_ref[...]).astype(out_ref.dtype)


# --------------------------------- wrapper ------------------------------------

def cnn1d_forward(x_ncl, params, *, pool_k=3, stride_1=2, stride=1,
                  batch_tile=256):
    """x_ncl: (B, in_channels, seq_length) — PyTorch layout."""
    B, Cin, L = x_ncl.shape
    W1, b1, bn1 = params["conv1_w"], params["conv1_b"], params["bn1"]
    W2, b2, bn2 = params["conv2_w"], params["conv2_b"], params["bn2"]
    Wfc, bfc = params["fc_w"], params["fc_b"]
    C1, C2, OUT = W1.shape[0], W2.shape[0], Wfc.shape[0]
    K = W1.shape[2]
    Lp1 = (L + 2 * _POOL_PAD - pool_k) // stride_1 + 1
    Lp2 = (Lp1 + 2 * _POOL_PAD - pool_k) // stride + 1
    assert Wfc.shape[1] == C2 * Lp2, "fc in_features inconsistent with pooling"

    # ---- fold eval-mode BatchNorm into the conv weights / bias ---------------
    def fold_bn(W, b, bn):
        gamma, beta, mean, var = bn[0], bn[1], bn[2], bn[3]
        scale = gamma * lax.rsqrt(var + _BN_EPS)
        return W * scale[:, None, None], (b - mean) * scale + beta

    W1f, b1f = fold_bn(W1, b1, bn1)
    W2f, b2f = fold_bn(W2, b2, bn2)

    # ---- layout plumbing (pure XLA, no in-kernel relayout) -------------------
    x_cl = jnp.transpose(x_ncl, (0, 2, 1))                           # (B, L, Cin)
    x_pad = jnp.pad(x_cl, ((0, 0), (_CONV_PAD, _CONV_PAD), (0, 0)))  # (B, L+2, Cin)

    w1_k = jnp.transpose(W1f, (2, 1, 0)).astype(jnp.float32)         # (K, Cin, C1)
    w2_k = jnp.transpose(W2f, (2, 1, 0)).astype(jnp.bfloat16)        # (K, C1, C2)
    b1_k = b1f.reshape(1, C1).astype(jnp.float32)
    b2_k = b2f.reshape(1, C2).astype(jnp.float32)

    # lane-dense FC output: pad OUT to a multiple of 128, slice outside the kernel
    OUTP = ((OUT + 127) // 128) * 128
    fcw_k = jnp.transpose(Wfc.reshape(OUT, C2, Lp2), (2, 1, 0))      # (Lp2, C2, OUT)
    fcw_k = jnp.pad(fcw_k, ((0, 0), (0, 0), (0, OUTP - OUT))).astype(jnp.bfloat16)
    fcb_k = jnp.pad(bfc, (0, OUTP - OUT)).reshape(1, OUTP).astype(jnp.float32)

    # ---- batch tiling --------------------------------------------------------
    TB = min(B, batch_tile)
    Bp = ((B + TB - 1) // TB) * TB
    if Bp != B:
        x_pad = jnp.pad(x_pad, ((0, Bp - B), (0, 0), (0, 0)))
    Lc = L + 2 * _CONV_PAD

    kernel = functools.partial(_cnn1d_kernel, pool_k=pool_k,
                               stride_1=stride_1, stride=stride)

    out = pl.pallas_call(
        kernel,
        out_shape=jax.ShapeDtypeStruct((Bp, OUTP), jnp.float32),
        grid_spec=pltpu.PrefetchScalarGridSpec(
            num_scalar_prefetch=0,
            grid=(Bp // TB,),
            in_specs=[
                pl.BlockSpec((TB, Lc, Cin), lambda i: (i, 0, 0)),      # x (padded)
                pl.BlockSpec((K, Cin, C1), lambda i: (0, 0, 0)),       # conv1 w
                pl.BlockSpec((1, C1), lambda i: (0, 0)),               # conv1 b
                pl.BlockSpec((K, C1, C2), lambda i: (0, 0, 0)),        # conv2 w
                pl.BlockSpec((1, C2), lambda i: (0, 0)),               # conv2 b
                pl.BlockSpec((Lp2, C2, OUTP), lambda i: (0, 0, 0)),    # fc w
                pl.BlockSpec((1, OUTP), lambda i: (0, 0)),             # fc b
            ],
            out_specs=pl.BlockSpec((TB, OUTP), lambda i: (i, 0)),
            scratch_shapes=[
                pltpu.VMEM((TB, L + 2 * _CONV_PAD, C1), jnp.float32),   # padded relu1
                pltpu.VMEM((TB, Lp1 + 2 * _CONV_PAD, C1), jnp.float32), # padded pool1
                pltpu.VMEM((TB, Lp1 + 2 * _CONV_PAD, C2), jnp.float32), # padded relu2
            ]),
        # batch axis shards across TensorCores (2 TCs on v7x); per-tile working
        # set at batch_tile=256 is < ~1 MiB, comfortably inside every
        # generation's scoped-VMEM default (incl. v7x's 64 MiB physical VMEM).
        compiler_params=pltpu.CompilerParams(
            dimension_semantics=("parallel",)),
    )(x_pad, w1_k, b1_k, w2_k, b2_k, fcw_k, fcb_k)

    return out[:B, :OUT]


# ------------------------- deterministic parameter init -----------------------

def init_params(key, *, seq_length, in_channels, n1, n2, out_channels,
                conv_k=3, pool_k=3, stride_1=2, stride=1):
    Lp1 = (seq_length + 2 * _POOL_PAD - pool_k) // stride_1 + 1
    Lp2 = (Lp1 + 2 * _POOL_PAD - pool_k) // stride + 1
    fc_in = n2 * math.ceil(seq_length / 2)   # module's final_fc_features formula
    assert fc_in == n2 * Lp2
    ks = jax.random.split(key, 14)

    def nrm(k, shape, scale):
        return (scale * jax.random.normal(k, shape)).astype(jnp.float32)

    def bn_params(kg, kb, km, kv, c):
        return jnp.stack([
            1.0 + 0.1 * jax.random.normal(kg, (c,)),
            0.1 * jax.random.normal(kb, (c,)),
            0.1 * jax.random.normal(km, (c,)),
            0.5 + jax.random.uniform(kv, (c,)),
        ]).astype(jnp.float32)

    return dict(
        conv1_w=nrm(ks[0], (n1, in_channels, conv_k), 1.0 / math.sqrt(in_channels * conv_k)),
        conv1_b=nrm(ks[1], (n1,), 0.1),
        bn1=bn_params(ks[2], ks[3], ks[4], ks[5], n1),
        conv2_w=nrm(ks[6], (n2, n1, conv_k), 1.0 / math.sqrt(n1 * conv_k)),
        conv2_b=nrm(ks[7], (n2,), 0.1),
        bn2=bn_params(ks[8], ks[9], ks[10], ks[11], n2),
        fc_w=nrm(ks[12], (out_channels, fc_in), 1.0 / math.sqrt(fc_in)),
        fc_b=nrm(ks[13], (out_channels,), 0.1),
    )


# ----------------------- plain-JAX reference (PyTorch layout) -----------------

def reference_forward(x, params, *, pool_k=3, stride_1=2, stride=1):
    def conv1d(h, w, b):
        y = lax.conv_general_dilated(h, w, window_strides=(1,), padding=[(1, 1)],
                                     dimension_numbers=("NCH", "OIH", "NCH"),
                                     precision=lax.Precision.HIGHEST)
        return y + b[None, :, None]

    def bn(h, p):
        g, be, m, v = p[0], p[1], p[2], p[3]
        return (h - m[None, :, None]) * (g / jnp.sqrt(v + _BN_EPS))[None, :, None] + be[None, :, None]

    def mpool(h, s):
        return lax.reduce_window(h, -jnp.inf, lax.max, (1, 1, pool_k), (1, 1, s),
                                 [(0, 0), (0, 0), (_POOL_PAD, _POOL_PAD)])

    h = conv1d(x, params["conv1_w"], params["conv1_b"])
    h = jnp.maximum(bn(h, params["bn1"]), 0.0)
    h = mpool(h, stride_1)
    h = conv1d(h, params["conv2_w"], params["conv2_b"])
    h = jnp.maximum(bn(h, params["bn2"]), 0.0)
    h = mpool(h, stride)
    h = h.reshape(h.shape[0], -1)                           # channel-major flatten
    return h @ params["fc_w"].T + params["fc_b"][None, :]


# ------------------------------------ main ------------------------------------

if __name__ == "__main__":
    B, CIN, SEQ = 2, 1, 16
    N1, N2, OUT = 16, 32, 64          # n_neurons_1, n_neurons_2, out_channels (small demo)
    key = jax.random.PRNGKey(0)
    kx, kp = jax.random.split(key)

    params = init_params(kp, seq_length=SEQ, in_channels=CIN, n1=N1, n2=N2,
                         out_channels=OUT)
    x = jax.random.normal(kx, (B, CIN, SEQ), dtype=jnp.float32)   # (batch, channels, seq)

    out = cnn1d_forward(x, params)
    out = jax.block_until_ready(out)
    assert out.shape == (B, OUT), out.shape

    ref = reference_forward(x, params)
    err = float(jnp.max(jnp.abs(out - ref)))
    tol = 3e-2 * (1.0 + float(jnp.max(jnp.abs(ref))))   # loose: bf16 MXU operands
    assert err <= tol, f"kernel/reference mismatch: max|diff|={err} tol={tol}"

    print("KERNEL_OK")
</pallas_src>

<mosaic_0001>
module attributes {stable_mosaic.version = 11 : i64} {
  func.func @_cnn1d_kernel(%arg0: i32, %arg1: memref<2x18x1xf32, #tpu.memory_space<vmem>>, %arg2: memref<3x1x16xf32, #tpu.memory_space<vmem>>, %arg3: memref<1x16xf32, #tpu.memory_space<vmem>>, %arg4: memref<3x16x32xbf16, #tpu.memory_space<vmem>>, %arg5: memref<1x32xf32, #tpu.memory_space<vmem>>, %arg6: memref<8x32x128xbf16, #tpu.memory_space<vmem>>, %arg7: memref<1x128xf32, #tpu.memory_space<vmem>>, %arg8: memref<2x128xf32, #tpu.memory_space<vmem>>, %arg9: memref<2x18x16xf32, #tpu.memory_space<vmem>>, %arg10: memref<2x10x16xf32, #tpu.memory_space<vmem>>, %arg11: memref<2x10x32xf32, #tpu.memory_space<vmem>>) attributes {dimension_semantics = [#tpu.dimension_semantics<parallel>], iteration_bounds = array<i64: 1>, scalar_prefetch = 0 : i64, scratch_operands = 3 : i64, tpu.core_type = #tpu.core_type<tc>, window_params = [{transform_indices = @transform_0, window_bounds = array<i64: 2, 18, 1>}, {pipeline_mode = #tpu.pipeline_mode<synchronous>, transform_indices = @transform_1, window_bounds = array<i64: 3, 1, 16>}, {pipeline_mode = #tpu.pipeline_mode<synchronous>, transform_indices = @transform_2, window_bounds = array<i64: 1, 16>}, {pipeline_mode = #tpu.pipeline_mode<synchronous>, transform_indices = @transform_3, window_bounds = array<i64: 3, 16, 32>}, {pipeline_mode = #tpu.pipeline_mode<synchronous>, transform_indices = @transform_4, window_bounds = array<i64: 1, 32>}, {pipeline_mode = #tpu.pipeline_mode<synchronous>, transform_indices = @transform_5, window_bounds = array<i64: 8, 32, 128>}, {pipeline_mode = #tpu.pipeline_mode<synchronous>, transform_indices = @transform_6, window_bounds = array<i64: 1, 128>}, {transform_indices = @transform_7, window_bounds = array<i64: 2, 128>}]} {
    %c0 = arith.constant 0 : index
    %c0_0 = arith.constant 0 : index
    %c0_1 = arith.constant 0 : index
    %0 = vector.load %arg1[%c0, %c0_0, %c0_1] : memref<2x18x1xf32, #tpu.memory_space<vmem>>, vector<2x18x1xf32>
    %c0_2 = arith.constant 0 : index
    %c0_3 = arith.constant 0 : index
    %c0_4 = arith.constant 0 : index
    %1 = vector.load %arg2[%c0_2, %c0_3, %c0_4] : memref<3x1x16xf32, #tpu.memory_space<vmem>>, vector<3x1x16xf32>
    %2 = vector.extract_strided_slice %0 {offsets = [0, 0, 0], sizes = [2, 16, 1], strides = [1, 1, 1]} : vector<2x18x1xf32> to vector<2x16x1xf32>
    %3 = vector.extract_strided_slice %1 {offsets = [0, 0, 0], sizes = [1, 1, 16], strides = [1, 1, 1]} : vector<3x1x16xf32> to vector<1x1x16xf32>
    %4 = vector.shape_cast %3 : vector<1x1x16xf32> to vector<1x16xf32>
    %5 = vector.shape_cast %4 : vector<1x16xf32> to vector<1x1x16xf32>
    %6 = vector.broadcast %2 : vector<2x16x1xf32> to vector<2x16x16xf32>
    %7 = vector.broadcast %5 : vector<1x1x16xf32> to vector<2x16x16xf32>
    %8 = arith.mulf %6, %7 : vector<2x16x16xf32>
    %9 = vector.extract_strided_slice %0 {offsets = [0, 1, 0], sizes = [2, 16, 1], strides = [1, 1, 1]} : vector<2x18x1xf32> to vector<2x16x1xf32>
    %10 = vector.extract_strided_slice %1 {offsets = [1, 0, 0], sizes = [1, 1, 16], strides = [1, 1, 1]} : vector<3x1x16xf32> to vector<1x1x16xf32>
    %11 = vector.shape_cast %10 : vector<1x1x16xf32> to vector<1x16xf32>
    %12 = vector.shape_cast %11 : vector<1x16xf32> to vector<1x1x16xf32>
    %13 = vector.broadcast %9 : vector<2x16x1xf32> to vector<2x16x16xf32>
    %14 = vector.broadcast %12 : vector<1x1x16xf32> to vector<2x16x16xf32>
    %15 = arith.mulf %13, %14 : vector<2x16x16xf32>
    %16 = arith.addf %8, %15 : vector<2x16x16xf32>
    %17 = vector.extract_strided_slice %0 {offsets = [0, 2, 0], sizes = [2, 16, 1], strides = [1, 1, 1]} : vector<2x18x1xf32> to vector<2x16x1xf32>
    %18 = vector.extract_strided_slice %1 {offsets = [2, 0, 0], sizes = [1, 1, 16], strides = [1, 1, 1]} : vector<3x1x16xf32> to vector<1x1x16xf32>
    %19 = vector.shape_cast %18 : vector<1x1x16xf32> to vector<1x16xf32>
    %20 = vector.shape_cast %19 : vector<1x16xf32> to vector<1x1x16xf32>
    %21 = vector.broadcast %17 : vector<2x16x1xf32> to vector<2x16x16xf32>
    %22 = vector.broadcast %20 : vector<1x1x16xf32> to vector<2x16x16xf32>
    %23 = arith.mulf %21, %22 : vector<2x16x16xf32>
    %24 = arith.addf %16, %23 : vector<2x16x16xf32>
    %c0_5 = arith.constant 0 : index
    %c0_6 = arith.constant 0 : index
    %25 = vector.load %arg3[%c0_5, %c0_6] : memref<1x16xf32, #tpu.memory_space<vmem>>, vector<1x16xf32>
    %26 = vector.shape_cast %25 : vector<1x16xf32> to vector<1x1x16xf32>
    %27 = vector.broadcast %26 : vector<1x1x16xf32> to vector<2x16x16xf32>
    %28 = arith.addf %24, %27 : vector<2x16x16xf32>
    %cst = arith.constant 0.000000e+00 : f32
    %29 = vector.broadcast %cst : f32 to vector<2x16x16xf32>
    %30 = arith.maximumf %28, %29 : vector<2x16x16xf32>
    %cst_7 = arith.constant 0.000000e+00 : f32
    %31 = vector.broadcast %cst_7 : f32 to vector<2x1x16xf32>
    %c0_8 = arith.constant 0 : index
    %c0_9 = arith.constant 0 : index
    %c0_10 = arith.constant 0 : index
    %32 = vector.load %arg9[%c0_8, %c0_9, %c0_10] : memref<2x18x16xf32, #tpu.memory_space<vmem>>, vector<2x1x16xf32>
    tpu.vector_store %arg9[%c0_8, %c0_9, %c0_10], %31 {strides = array<i32>} : memref<2x18x16xf32, #tpu.memory_space<vmem>>, vector<2x1x16xf32>,
    %c0_11 = arith.constant 0 : index
    %c17 = arith.constant 17 : index
    %c0_12 = arith.constant 0 : index
    %33 = vector.load %arg9[%c0_11, %c17, %c0_12] : memref<2x18x16xf32, #tpu.memory_space<vmem>>, vector<2x1x16xf32>
    tpu.vector_store %arg9[%c0_11, %c17, %c0_12], %31 {strides = array<i32>} : memref<2x18x16xf32, #tpu.memory_space<vmem>>, vector<2x1x16xf32>,
    %c0_13 = arith.constant 0 : index
    %c1 = arith.constant 1 : index
    %c0_14 = arith.constant 0 : index
    %34 = vector.load %arg9[%c0_13, %c1, %c0_14] : memref<2x18x16xf32, #tpu.memory_space<vmem>>, vector<2x16x16xf32>
    tpu.vector_store %arg9[%c0_13, %c1, %c0_14], %30 {strides = array<i32>} : memref<2x18x16xf32, #tpu.memory_space<vmem>>, vector<2x16x16xf32>,
    %c0_15 = arith.constant 0 : index
    %c0_16 = arith.constant 0 : index
    %c0_17 = arith.constant 0 : index
    %35 = tpu.strided_load %arg9[%c0_15, %c0_16, %c0_17] {strides = array<i32: 1, 2, 1>} : memref<2x18x16xf32, #tpu.memory_space<vmem>>, vector<2x8x16xf32>
    %c0_18 = arith.constant 0 : index
    %c1_19 = arith.constant 1 : index
    %c0_20 = arith.constant 0 : index
    %36 = tpu.strided_load %arg9[%c0_18, %c1_19, %c0_20] {strides = array<i32: 1, 2, 1>} : memref<2x18x16xf32, #tpu.memory_space<vmem>>, vector<2x8x16xf32>
    %37 = arith.maximumf %35, %36 : vector<2x8x16xf32>
    %c0_21 = arith.constant 0 : index
    %c2 = arith.constant 2 : index
    %c0_22 = arith.constant 0 : index
    %38 = tpu.strided_load %arg9[%c0_21, %c2, %c0_22] {strides = array<i32: 1, 2, 1>} : memref<2x18x16xf32, #tpu.memory_space<vmem>>, vector<2x8x16xf32>
    %39 = arith.maximumf %37, %38 : vector<2x8x16xf32>
    %c0_23 = arith.constant 0 : index
    %c0_24 = arith.constant 0 : index
    %c0_25 = arith.constant 0 : index
    %40 = vector.load %arg10[%c0_23, %c0_24, %c0_25] : memref<2x10x16xf32, #tpu.memory_space<vmem>>, vector<2x1x16xf32>
    tpu.vector_store %arg10[%c0_23, %c0_24, %c0_25], %31 {strides = array<i32>} : memref<2x10x16xf32, #tpu.memory_space<vmem>>, vector<2x1x16xf32>,
    %c0_26 = arith.constant 0 : index
    %c9 = arith.constant 9 : index
    %c0_27 = arith.constant 0 : index
    %41 = vector.load %arg10[%c0_26, %c9, %c0_27] : memref<2x10x16xf32, #tpu.memory_space<vmem>>, vector<2x1x16xf32>
    tpu.vector_store %arg10[%c0_26, %c9, %c0_27], %31 {strides = array<i32>} : memref<2x10x16xf32, #tpu.memory_space<vmem>>, vector<2x1x16xf32>,
    %c0_28 = arith.constant 0 : index
    %c1_29 = arith.constant 1 : index
    %c0_30 = arith.constant 0 : index
    %42 = vector.load %arg10[%c0_28, %c1_29, %c0_30] : memref<2x10x16xf32, #tpu.memory_space<vmem>>, vector<2x8x16xf32>
    tpu.vector_store %arg10[%c0_28, %c1_29, %c0_30], %39 {strides = array<i32>} : memref<2x10x16xf32, #tpu.memory_space<vmem>>, vector<2x8x16xf32>,
    %cst_31 = arith.constant 0.000000e+00 : f32
    %43 = vector.broadcast %cst_31 : f32 to vector<16x32xf32>
    %c0_32 = arith.constant 0 : index
    %c0_33 = arith.constant 0 : index
    %c0_34 = arith.constant 0 : index
    %44 = vector.load %arg10[%c0_32, %c0_33, %c0_34] : memref<2x10x16xf32, #tpu.memory_space<vmem>>, vector<2x8x16xf32>
    %45 = vector.shape_cast %44 : vector<2x8x16xf32> to vector<16x16xf32>
    %46 = arith.truncf %45 : vector<16x16xf32> to vector<16x16xbf16>
    %c0_35 = arith.constant 0 : index
    %c0_36 = arith.constant 0 : index
    %c0_37 = arith.constant 0 : index
    %47 = vector.load %arg4[%c0_35, %c0_36, %c0_37] : memref<3x16x32xbf16, #tpu.memory_space<vmem>>, vector<1x16x32xbf16>
    %48 = vector.shape_cast %47 : vector<1x16x32xbf16> to vector<16x32xbf16>
    %cst_38 = arith.constant dense<0.000000e+00> : vector<16x32xf32>
    %49 = tpu.matmul %46, %48, %cst_38 {dimension_numbers = #tpu.dot_dimension_numbers<[1], [0], [0], [1], [0, 0, 1, 1], [], []>} : vector<16x16xbf16>, vector<16x32xbf16>, vector<16x32xf32> -> vector<16x32xf32>
    %50 = arith.addf %43, %49 : vector<16x32xf32>
    %c0_39 = arith.constant 0 : index
    %c1_40 = arith.constant 1 : index
    %c0_41 = arith.constant 0 : index
    %51 = vector.load %arg10[%c0_39, %c1_40, %c0_41] : memref<2x10x16xf32, #tpu.memory_space<vmem>>, vector<2x8x16xf32>
    %52 = vector.shape_cast %51 : vector<2x8x16xf32> to vector<16x16xf32>
    %53 = arith.truncf %52 : vector<16x16xf32> to vector<16x16xbf16>
    %c1_42 = arith.constant 1 : index
    %c0_43 = arith.constant 0 : index
    %c0_44 = arith.constant 0 : index
    %54 = vector.load %arg4[%c1_42, %c0_43, %c0_44] : memref<3x16x32xbf16, #tpu.memory_space<vmem>>, vector<1x16x32xbf16>
    %55 = vector.shape_cast %54 : vector<1x16x32xbf16> to vector<16x32xbf16>
    %cst_45 = arith.constant dense<0.000000e+00> : vector<16x32xf32>
    %56 = tpu.matmul %53, %55, %cst_45 {dimension_numbers = #tpu.dot_dimension_numbers<[1], [0], [0], [1], [0, 0, 1, 1], [], []>} : vector<16x16xbf16>, vector<16x32xbf16>, vector<16x32xf32> -> vector<16x32xf32>
    %57 = arith.addf %50, %56 : vector<16x32xf32>
    %c0_46 = arith.constant 0 : index
    %c2_47 = arith.constant 2 : index
    %c0_48 = arith.constant 0 : index
    %58 = vector.load %arg10[%c0_46, %c2_47, %c0_48] : memref<2x10x16xf32, #tpu.memory_space<vmem>>, vector<2x8x16xf32>
    %59 = vector.shape_cast %58 : vector<2x8x16xf32> to vector<16x16xf32>
    %60 = arith.truncf %59 : vector<16x16xf32> to vector<16x16xbf16>
    %c2_49 = arith.constant 2 : index
    %c0_50 = arith.constant 0 : index
    %c0_51 = arith.constant 0 : index
    %61 = vector.load %arg4[%c2_49, %c0_50, %c0_51] : memref<3x16x32xbf16, #tpu.memory_space<vmem>>, vector<1x16x32xbf16>
    %62 = vector.shape_cast %61 : vector<1x16x32xbf16> to vector<16x32xbf16>
    %cst_52 = arith.constant dense<0.000000e+00> : vector<16x32xf32>
    %63 = tpu.matmul %60, %62, %cst_52 {dimension_numbers = #tpu.dot_dimension_numbers<[1], [0], [0], [1], [0, 0, 1, 1], [], []>} : vector<16x16xbf16>, vector<16x32xbf16>, vector<16x32xf32> -> vector<16x32xf32>
    %64 = arith.addf %57, %63 : vector<16x32xf32>
    %c0_53 = arith.constant 0 : index
    %c0_54 = arith.constant 0 : index
    %65 = vector.load %arg5[%c0_53, %c0_54] : memref<1x32xf32, #tpu.memory_space<vmem>>, vector<1x32xf32>
    %66 = vector.broadcast %65 : vector<1x32xf32> to vector<16x32xf32>
    %67 = arith.addf %64, %66 : vector<16x32xf32>
    %cst_55 = arith.constant 0.000000e+00 : f32
    %68 = vector.broadcast %cst_55 : f32 to vector<16x32xf32>
    %69 = arith.maximumf %67, %68 : vector<16x32xf32>
    %70 = vector.shape_cast %69 : vector<16x32xf32> to vector<2x8x32xf32>
    %cst_56 = arith.constant 0.000000e+00 : f32
    %71 = vector.broadcast %cst_56 : f32 to vector<2x1x32xf32>
    %c0_57 = arith.constant 0 : index
    %c0_58 = arith.constant 0 : index
    %c0_59 = arith.constant 0 : index
    %72 = vector.load %arg11[%c0_57, %c0_58, %c0_59] : memref<2x10x32xf32, #tpu.memory_space<vmem>>, vector<2x1x32xf32>
    tpu.vector_store %arg11[%c0_57, %c0_58, %c0_59], %71 {strides = array<i32>} : memref<2x10x32xf32, #tpu.memory_space<vmem>>, vector<2x1x32xf32>,
    %c0_60 = arith.constant 0 : index
    %c9_61 = arith.constant 9 : index
    %c0_62 = arith.constant 0 : index
    %73 = vector.load %arg11[%c0_60, %c9_61, %c0_62] : memref<2x10x32xf32, #tpu.memory_space<vmem>>, vector<2x1x32xf32>
    tpu.vector_store %arg11[%c0_60, %c9_61, %c0_62], %71 {strides = array<i32>} : memref<2x10x32xf32, #tpu.memory_space<vmem>>, vector<2x1x32xf32>,
    %c0_63 = arith.constant 0 : index
    %c1_64 = arith.constant 1 : index
    %c0_65 = arith.constant 0 : index
    %74 = vector.load %arg11[%c0_63, %c1_64, %c0_65] : memref<2x10x32xf32, #tpu.memory_space<vmem>>, vector<2x8x32xf32>
    tpu.vector_store %arg11[%c0_63, %c1_64, %c0_65], %70 {strides = array<i32>} : memref<2x10x32xf32, #tpu.memory_space<vmem>>, vector<2x8x32xf32>,
    %c0_66 = arith.constant 0 : index
    %c0_67 = arith.constant 0 : index
    %c0_68 = arith.constant 0 : index
    %75 = vector.load %arg11[%c0_66, %c0_67, %c0_68] : memref<2x10x32xf32, #tpu.memory_space<vmem>>, vector<2x8x32xf32>
    %c0_69 = arith.constant 0 : index
    %c1_70 = arith.constant 1 : index
    %c0_71 = arith.constant 0 : index
    %76 = vector.load %arg11[%c0_69, %c1_70, %c0_71] : memref<2x10x32xf32, #tpu.memory_space<vmem>>, vector<2x8x32xf32>
    %77 = arith.maximumf %75, %76 : vector<2x8x32xf32>
    %c0_72 = arith.constant 0 : index
    %c2_73 = arith.constant 2 : index
    %c0_74 = arith.constant 0 : index
    %78 = vector.load %arg11[%c0_72, %c2_73, %c0_74] : memref<2x10x32xf32, #tpu.memory_space<vmem>>, vector<2x8x32xf32>
    %79 = arith.maximumf %77, %78 : vector<2x8x32xf32>
    %cst_75 = arith.constant 0.000000e+00 : f32
    %80 = vector.broadcast %cst_75 : f32 to vector<2x128xf32>
    %81 = vector.extract_strided_slice %79 {offsets = [0, 0, 0], sizes = [2, 1, 32], strides = [1, 1, 1]} : vector<2x8x32xf32> to vector<2x1x32xf32>
    %82 = vector.shape_cast %81 : vector<2x1x32xf32> to vector<2x32xf32>
    %83 = arith.truncf %82 : vector<2x32xf32> to vector<2x32xbf16>
    %c0_76 = arith.constant 0 : index
    %c0_77 = arith.constant 0 : index
    %c0_78 = arith.constant 0 : index
    %84 = vector.load %arg6[%c0_76, %c0_77, %c0_78] : memref<8x32x128xbf16, #tpu.memory_space<vmem>>, vector<1x32x128xbf16>
    %85 = vector.shape_cast %84 : vector<1x32x128xbf16> to vector<32x128xbf16>
    %cst_79 = arith.constant dense<0.000000e+00> : vector<2x128xf32>
    %86 = tpu.matmul %83, %85, %cst_79 {dimension_numbers = #tpu.dot_dimension_numbers<[1], [0], [0], [1], [0, 0, 1, 1], [], []>} : vector<2x32xbf16>, vector<32x128xbf16>, vector<2x128xf32> -> vector<2x128xf32>
    %87 = arith.addf %80, %86 : vector<2x128xf32>
    %88 = vector.extract_strided_slice %79 {offsets = [0, 1, 0], sizes = [2, 1, 32], strides = [1, 1, 1]} : vector<2x8x32xf32> to vector<2x1x32xf32>
    %89 = vector.shape_cast %88 : vector<2x1x32xf32> to vector<2x32xf32>
    %90 = arith.truncf %89 : vector<2x32xf32> to vector<2x32xbf16>
    %c1_80 = arith.constant 1 : index
    %c0_81 = arith.constant 0 : index
    %c0_82 = arith.constant 0 : index
    %91 = vector.load %arg6[%c1_80, %c0_81, %c0_82] : memref<8x32x128xbf16, #tpu.memory_space<vmem>>, vector<1x32x128xbf16>
    %92 = vector.shape_cast %91 : vector<1x32x128xbf16> to vector<32x128xbf16>
    %cst_83 = arith.constant dense<0.000000e+00> : vector<2x128xf32>
    %93 = tpu.matmul %90, %92, %cst_83 {dimension_numbers = #tpu.dot_dimension_numbers<[1], [0], [0], [1], [0, 0, 1, 1], [], []>} : vector<2x32xbf16>, vector<32x128xbf16>, vector<2x128xf32> -> vector<2x128xf32>
    %94 = arith.addf %87, %93 : vector<2x128xf32>
    %95 = vector.extract_strided_slice %79 {offsets = [0, 2, 0], sizes = [2, 1, 32], strides = [1, 1, 1]} : vector<2x8x32xf32> to vector<2x1x32xf32>
    %96 = vector.shape_cast %95 : vector<2x1x32xf32> to vector<2x32xf32>
    %97 = arith.truncf %96 : vector<2x32xf32> to vector<2x32xbf16>
    %c2_84 = arith.constant 2 : index
    %c0_85 = arith.constant 0 : index
    %c0_86 = arith.constant 0 : index
    %98 = vector.load %arg6[%c2_84, %c0_85, %c0_86] : memref<8x32x128xbf16, #tpu.memory_space<vmem>>, vector<1x32x128xbf16>
    %99 = vector.shape_cast %98 : vector<1x32x128xbf16> to vector<32x128xbf16>
    %cst_87 = arith.constant dense<0.000000e+00> : vector<2x128xf32>
    %100 = tpu.matmul %97, %99, %cst_87 {dimension_numbers = #tpu.dot_dimension_numbers<[1], [0], [0], [1], [0, 0, 1, 1], [], []>} : vector<2x32xbf16>, vector<32x128xbf16>, vector<2x128xf32> -> vector<2x128xf32>
    %101 = arith.addf %94, %100 : vector<2x128xf32>
    %102 = vector.extract_strided_slice %79 {offsets = [0, 3, 0], sizes = [2, 1, 32], strides = [1, 1, 1]} : vector<2x8x32xf32> to vector<2x1x32xf32>
    %103 = vector.shape_cast %102 : vector<2x1x32xf32> to vector<2x32xf32>
    %104 = arith.truncf %103 : vector<2x32xf32> to vector<2x32xbf16>
    %c3 = arith.constant 3 : index
    %c0_88 = arith.constant 0 : index
    %c0_89 = arith.constant 0 : index
    %105 = vector.load %arg6[%c3, %c0_88, %c0_89] : memref<8x32x128xbf16, #tpu.memory_space<vmem>>, vector<1x32x128xbf16>
    %106 = vector.shape_cast %105 : vector<1x32x128xbf16> to vector<32x128xbf16>
    %cst_90 = arith.constant dense<0.000000e+00> : vector<2x128xf32>
    %107 = tpu.matmul %104, %106, %cst_90 {dimension_numbers = #tpu.dot_dimension_numbers<[1], [0], [0], [1], [0, 0, 1, 1], [], []>} : vector<2x32xbf16>, vector<32x128xbf16>, vector<2x128xf32> -> vector<2x128xf32>
    %108 = arith.addf %101, %107 : vector<2x128xf32>
    %109 = vector.extract_strided_slice %79 {offsets = [0, 4, 0], sizes = [2, 1, 32], strides = [1, 1, 1]} : vector<2x8x32xf32> to vector<2x1x32xf32>
    %110 = vector.shape_cast %109 : vector<2x1x32xf32> to vector<2x32xf32>
    %111 = arith.truncf %110 : vector<2x32xf32> to vector<2x32xbf16>
    %c4 = arith.constant 4 : index
    %c0_91 = arith.constant 0 : index
    %c0_92 = arith.constant 0 : index
    %112 = vector.load %arg6[%c4, %c0_91, %c0_92] : memref<8x32x128xbf16, #tpu.memory_space<vmem>>, vector<1x32x128xbf16>
    %113 = vector.shape_cast %112 : vector<1x32x128xbf16> to vector<32x128xbf16>
    %cst_93 = arith.constant dense<0.000000e+00> : vector<2x128xf32>
    %114 = tpu.matmul %111, %113, %cst_93 {dimension_numbers = #tpu.dot_dimension_numbers<[1], [0], [0], [1], [0, 0, 1, 1], [], []>} : vector<2x32xbf16>, vector<32x128xbf16>, vector<2x128xf32> -> vector<2x128xf32>
    %115 = arith.addf %108, %114 : vector<2x128xf32>
    %116 = vector.extract_strided_slice %79 {offsets = [0, 5, 0], sizes = [2, 1, 32], strides = [1, 1, 1]} : vector<2x8x32xf32> to vector<2x1x32xf32>
    %117 = vector.shape_cast %116 : vector<2x1x32xf32> to vector<2x32xf32>
    %118 = arith.truncf %117 : vector<2x32xf32> to vector<2x32xbf16>
    %c5 = arith.constant 5 : index
    %c0_94 = arith.constant 0 : index
    %c0_95 = arith.constant 0 : index
    %119 = vector.load %arg6[%c5, %c0_94, %c0_95] : memref<8x32x128xbf16, #tpu.memory_space<vmem>>, vector<1x32x128xbf16>
    %120 = vector.shape_cast %119 : vector<1x32x128xbf16> to vector<32x128xbf16>
    %cst_96 = arith.constant dense<0.000000e+00> : vector<2x128xf32>
    %121 = tpu.matmul %118, %120, %cst_96 {dimension_numbers = #tpu.dot_dimension_numbers<[1], [0], [0], [1], [0, 0, 1, 1], [], []>} : vector<2x32xbf16>, vector<32x128xbf16>, vector<2x128xf32> -> vector<2x128xf32>
    %122 = arith.addf %115, %121 : vector<2x128xf32>
    %123 = vector.extract_strided_slice %79 {offsets = [0, 6, 0], sizes = [2, 1, 32], strides = [1, 1, 1]} : vector<2x8x32xf32> to vector<2x1x32xf32>
    %124 = vector.shape_cast %123 : vector<2x1x32xf32> to vector<2x32xf32>
    %125 = arith.truncf %124 : vector<2x32xf32> to vector<2x32xbf16>
    %c6 = arith.constant 6 : index
    %c0_97 = arith.constant 0 : index
    %c0_98 = arith.constant 0 : index
    %126 = vector.load %arg6[%c6, %c0_97, %c0_98] : memref<8x32x128xbf16, #tpu.memory_space<vmem>>, vector<1x32x128xbf16>
    %127 = vector.shape_cast %126 : vector<1x32x128xbf16> to vector<32x128xbf16>
    %cst_99 = arith.constant dense<0.000000e+00> : vector<2x128xf32>
    %128 = tpu.matmul %125, %127, %cst_99 {dimension_numbers = #tpu.dot_dimension_numbers<[1], [0], [0], [1], [0, 0, 1, 1], [], []>} : vector<2x32xbf16>, vector<32x128xbf16>, vector<2x128xf32> -> vector<2x128xf32>
    %129 = arith.addf %122, %128 : vector<2x128xf32>
    %130 = vector.extract_strided_slice %79 {offsets = [0, 7, 0], sizes = [2, 1, 32], strides = [1, 1, 1]} : vector<2x8x32xf32> to vector<2x1x32xf32>
    %131 = vector.shape_cast %130 : vector<2x1x32xf32> to vector<2x32xf32>
    %132 = arith.truncf %131 : vector<2x32xf32> to vector<2x32xbf16>
    %c7 = arith.constant 7 : index
    %c0_100 = arith.constant 0 : index
    %c0_101 = arith.constant 0 : index
    %133 = vector.load %arg6[%c7, %c0_100, %c0_101] : memref<8x32x128xbf16, #tpu.memory_space<vmem>>, vector<1x32x128xbf16>
    %134 = vector.shape_cast %133 : vector<1x32x128xbf16> to vector<32x128xbf16>
    %cst_102 = arith.constant dense<0.000000e+00> : vector<2x128xf32>
    %135 = tpu.matmul %132, %134, %cst_102 {dimension_numbers = #tpu.dot_dimension_numbers<[1], [0], [0], [1], [0, 0, 1, 1], [], []>} : vector<2x32xbf16>, vector<32x128xbf16>, vector<2x128xf32> -> vector<2x128xf32>
    %136 = arith.addf %129, %135 : vector<2x128xf32>
    %c0_103 = arith.constant 0 : index
    %c0_104 = arith.constant 0 : index
    %137 = vector.load %arg7[%c0_103, %c0_104] : memref<1x128xf32, #tpu.memory_space<vmem>>, vector<1x128xf32>
    %138 = vector.broadcast %137 : vector<1x128xf32> to vector<2x128xf32>
    %139 = arith.addf %136, %138 : vector<2x128xf32>
    %c0_105 = arith.constant 0 : index
    %c0_106 = arith.constant 0 : index
    %140 = vector.load %arg8[%c0_105, %c0_106] : memref<2x128xf32, #tpu.memory_space<vmem>>, vector<2x128xf32>
    tpu.vector_store %arg8[%c0_105, %c0_106], %139 {strides = array<i32>} : memref<2x128xf32, #tpu.memory_space<vmem>>, vector<2x128xf32>,
    return
  }
  func.func @transform_0(%arg0: i32) -> (i32, i32, i32) {
    %c0_i32 = arith.constant 0 : i32
    %c0_i32_0 = arith.constant 0 : i32
    %c0_i32_1 = arith.constant 0 : i32
    return %arg0, %c0_i32, %c0_i32_0 : i32, i32, i32
  }
  func.func @transform_1(%arg0: i32) -> (i32, i32, i32) {
    %c0_i32 = arith.constant 0 : i32
    %c0_i32_0 = arith.constant 0 : i32
    %c0_i32_1 = arith.constant 0 : i32
    %c0_i32_2 = arith.constant 0 : i32
    return %c0_i32, %c0_i32_0, %c0_i32_1 : i32, i32, i32
  }
  func.func @transform_2(%arg0: i32) -> (i32, i32) {
    %c0_i32 = arith.constant 0 : i32
    %c0_i32_0 = arith.constant 0 : i32
    %c0_i32_1 = arith.constant 0 : i32
    return %c0_i32, %c0_i32_0 : i32, i32
  }
  func.func @transform_3(%arg0: i32) -> (i32, i32, i32) {
    %c0_i32 = arith.constant 0 : i32
    %c0_i32_0 = arith.constant 0 : i32
    %c0_i32_1 = arith.constant 0 : i32
    %c0_i32_2 = arith.constant 0 : i32
    return %c0_i32, %c0_i32_0, %c0_i32_1 : i32, i32, i32
  }
  func.func @transform_4(%arg0: i32) -> (i32, i32) {
    %c0_i32 = arith.constant 0 : i32
    %c0_i32_0 = arith.constant 0 : i32
    %c0_i32_1 = arith.constant 0 : i32
    return %c0_i32, %c0_i32_0 : i32, i32
  }
  func.func @transform_5(%arg0: i32) -> (i32, i32, i32) {
    %c0_i32 = arith.constant 0 : i32
    %c0_i32_0 = arith.constant 0 : i32
    %c0_i32_1 = arith.constant 0 : i32
    %c0_i32_2 = arith.constant 0 : i32
    return %c0_i32, %c0_i32_0, %c0_i32_1 : i32, i32, i32
  }
  func.func @transform_6(%arg0: i32) -> (i32, i32) {
    %c0_i32 = arith.constant 0 : i32
    %c0_i32_0 = arith.constant 0 : i32
    %c0_i32_1 = arith.constant 0 : i32
    return %c0_i32, %c0_i32_0 : i32, i32
  }
  func.func @transform_7(%arg0: i32) -> (i32, i32) {
    %c0_i32 = arith.constant 0 : i32
    %c0_i32_0 = arith.constant 0 : i32
    return %arg0, %c0_i32 : i32, i32
  }
}

</mosaic_0001>

<bundles_post_ra>
// kernel: tpu_custom_call.1
= control target key start
LH: loop header
LB: loop body
LE: loop exit
PB: predicated region body
PF: predicated region fallthrough
CT: control target
= control target key end

     0   :  { %12 = vsyncpa [#allocation6], 0  ;;  %s969_s0 = inlined_call_operand.vmem [shape: f32[2,18,1], index: 0, kind: input, shape index: {}]   ;;  %s970_s1 = inlined_call_operand.vmem [shape: f32[3,1,16], index: 1, kind: input, shape index: {}]   ;;  %s971_s2 = inlined_call_operand.vmem [shape: f32[1,16], index: 2, kind: input, shape index: {}]   ;;  %s972_s3 = inlined_call_operand.vmem [shape: bf16[3,16,32], index: 3, kind: input, shape index: {}]   ;;  %s973_s4 = inlined_call_operand.vmem [shape: f32[1,32], index: 4, kind: input, shape index: {}]   ;;  %s974_s5 = inlined_call_operand.hbm [shape: bf16[8,32,128], index: 5, kind: input, shape index: {}]   ;;  %s975_s6 = inlined_call_operand.vmem [shape: f32[1,128], index: 6, kind: input, shape index: {}]   ;;  %s976_s7 = inlined_call_operand.hbm [shape: f32[2,128], index: 7, kind: output, shape index: {}]  }
   0x1   :  { %13 = vsyncpa [#allocation7], 0  ;;  %s28_s26 = sshll.u32 %s974_s5, 4  ;;  %s821_s27 = smov [#allocation5]   ;;  %s29_s26 = int_to_ptr.hbm [resolvable:$true] %s28_s26 }
   0x2   :  { %s30_s28 = sshll.u32 %s821_s27, 4  ;;  %s822_s29 = smov 64   ;;  %s31_s28 = int_to_ptr.vmem [resolvable:$true] %s30_s28 }
   0x3   :  { %s823_s30 = smov 4  }
   0x4   :  { %36 = dma.hbm_to_vmem [thread:$0]  %s29_s26, 2048, %s31_s28, [#allocation6], %s822_s29, %s822_s29, %s823_s30  }
   0x5   :  { %817 = dma.done.wait [#allocation6], 2048  }
   0x6   :  { %818 = vsyncadd [#allocation6], 4294965248  ;;  %v824_v0 = vmov 0   ;;  %v47_v1 = vld [vmem:[%s969_s0 + $0x18] sm:$0xff]  ;;  %v44_v2 = vld [vmem:[%s969_s0] sm:$0xff]  ;;  %vm170_vm0 = vcmask 122880  }
   0x7   :  { %761 = vset.pattern.permute.xlu1 %v824_v0  ;;  %760 = vset.pattern.permute.xlu0 %v824_v0  ;;  %v46_v3 = vld [vmem:[%s969_s0 + $0x10] sm:$0x3]  ;;  %v48_v4 = vld [vmem:[%s969_s0 + $0x20] sm:$0xff]  ;;  %v45_v5 = vld [vmem:[%s969_s0 + $0x8] sm:$0xff]  ;;  %v825_v11 = vmov 0.0   ;;  %vm105_vm1 = vcmask 1046528  }
   0x8   :  { %762 = vset.pattern.permute.xlu2 %v824_v0  ;;  %65 = vperm.xlu1 %761, %v47_v1   ;;  %v49_v6 = vld [vmem:[%s969_s0 + $0x28] sm:$0x3]  ;;  %v735_v9 = vld [vmem:[%s972_s3] sm:$0xff]  ;;  %v737_v10 = vld [vmem:[%s972_s3 + $0x10] sm:$0xff]  ;;  %171 = vst.msk [vmem:[#allocation2] sm:$0x1] %vm170_vm0, %v825_v11 }
   0x9   :  { %55 = vperm.xlu0 %760, %v44_v2   ;;  %82 = vperm.xlu2 %762, %v46_v3   ;;  %v736_v8 = vld [vmem:[%s972_s3 + $0x8] sm:$0xff]  ;;  %172 = vst.msk [vmem:[#allocation2 + $0x18] sm:$0x1] %vm170_vm0, %v825_v11  ;;  %v763_v12 = vld [vmem:[%s970_s1 + $0x1] ss:$0 sm:$0xff]  ;;  %vm139_vm2 = vcmask 1045504  }
   0xa   :  { %228 = vmatpush.bf16.msra.mxu0 %v736_v8  ;;  %251 = vmatpush.bf16.msra.mxu1 %v735_v9  ;;  %195 = vst.msk [vmem:[#allocation3] sm:$0x1] %vm170_vm0, %v825_v11  ;;  %v764_v13 = vld [vmem:[%s970_s1 + $0x2] ss:$0 sm:$0xff]  ;;  %v765_v21 = vld [vmem:[%s970_s1] ss:$0 sm:$0xff] }
   0xb   :  { %280 = vmatpush.bf16.msra.mxu2 %v737_v10  ;;  %196 = vst.msk [vmem:[#allocation3 + $0x10] sm:$0x1] %vm170_vm0, %v825_v11  ;;  %v766_v50 = vld [vmem:[%s971_s2] ss:$0 sm:$0xff]  ;;  %vm175_vm3 = vcmask 130048   ;;  %vm297_vm4 = vcmask 253952  }
   0xc   :  { %197 = vst.msk [vmem:[#allocation3 + $0x9] sm:$0x1] %vm170_vm0, %v825_v11  ;;  %vm302_vm5 = vcmask 261120   ;;  %vm331_vm6 = vcmask 1041409   ;;  %s826_s9 = smov [#allocation8]   ;;  %s634_s12 = sshll.u32 %s976_s7, 4  ;;  %s635_s12 = int_to_ptr.hbm [resolvable:$true] %s634_s12 }
   0xd   :  { %198 = vst.msk [vmem:[#allocation3 + $0x19] sm:$0x1] %vm170_vm0, %v825_v11  ;;  %s632_s10 = sshll.u32 %s826_s9, 4  ;;  %s633_s10 = int_to_ptr.vmem [resolvable:$true] %s632_s10 }
   0xe   :  { %298 = vst.msk [vmem:[#allocation4] sm:$0x1] %vm297_vm4, %v825_v11 }
   0xf   :  { %300 = vst.msk [vmem:[#allocation4 + $0x9] sm:$0x1] %vm297_vm4, %v825_v11 }
  0x10   :  { %70 = vperm.xlu1 %761, %v48_v4   ;;  %299 = vst.msk [vmem:[#allocation4 + $0x10] sm:$0x1] %vm297_vm4, %v825_v11 }
  0x11   :  { %60 = vperm.xlu0 %760, %v45_v5   ;;  %87 = vperm.xlu2 %762, %v49_v6   ;;  %301 = vst.msk [vmem:[#allocation4 + $0x19] sm:$0x1] %vm297_vm4, %v825_v11  ;;  %v767_v11 = vld [vmem:[%s973_s4] ss:$0 sm:$0xff] }
  0x63   :  { %v83_v7 = vpop.permute.xlu2 %82 }
  0x64   :  { %v95_v17 = vmul.f32 %v763_v12, %v83_v7  ;;  %v129_v18 = vmul.f32 %v764_v13, %v83_v7 }
  0x66   :  { %v109_v24 = vrot.slane %v95_v17, 1  ;;  %v143_v25 = vrot.slane %v129_v18, 2 }
  0x6b   :  { %v88_v16 = vpop.permute.xlu2 %87 }
  0x6c   :  { %v98_v19 = vmul.f32 %v763_v12, %v88_v16  ;;  %v132_v20 = vmul.f32 %v764_v13, %v88_v16 }
  0x6e   :  { %v114_v26 = vrot.slane %v98_v19, 1  ;;  %v148_v30 = vrot.slane %v132_v20, 2 }
  0x7a   :  { %v66_v14 = vpop.permute.xlu1 %65 }
  0x7b   :  { %v56_v15 = vpop.permute.xlu0 %55  ;;  %v96_v22 = vmul.f32 %v763_v12, %v66_v14  ;;  %v130_v23 = vmul.f32 %v764_v13, %v66_v14  ;;  %v78_v34 = vmul.f32 %v765_v21, %v66_v14 }
  0x7c   :  { %v93_v27 = vmul.f32 %v763_v12, %v56_v15  ;;  %v127_v31 = vmul.f32 %v764_v13, %v56_v15  ;;  %v76_v35 = vmul.f32 %v765_v21, %v56_v15 }
  0x7d   :  { %v111_v38 = vrot.slane %v96_v22, 1  ;;  %v145_v39 = vrot.slane %v130_v23, 2 }
  0x7e   :  { %v106_v42 = vrot.slane %v93_v27, 1  ;;  %v140_v46 = vrot.slane %v127_v31, 2  ;;  %v741_v31 = vld [vmem:[#allocation5 + $0x18] sm:$0xff] }
  0x7f   :  { %355 = vmatpush.bf16.msra.mxu3 %v741_v31 }
  0x82   :  { %v71_v28 = vpop.permute.xlu1 %70 }
  0x83   :  { %v61_v29 = vpop.permute.xlu0 %60  ;;  %v97_v32 = vmul.f32 %v763_v12, %v71_v28  ;;  %v131_v33 = vmul.f32 %v764_v13, %v71_v28  ;;  %v79_v43 = vmul.f32 %v765_v21, %v71_v28 }
  0x84   :  { %v94_v36 = vmul.f32 %v763_v12, %v61_v29  ;;  %v128_v37 = vmul.f32 %v764_v13, %v61_v29  ;;  %v77_v49 = vmul.f32 %v765_v21, %v61_v29  ;;  %v745_v29 = vld [vmem:[#allocation5 + $0x38] sm:$0xff] }
  0x85   :  { %v112_v40 = vrot.slane %v97_v32, 1  ;;  %v146_v41 = vrot.slane %v131_v33, 2  ;;  %v743_v32 = vld [vmem:[#allocation5 + $0x28] sm:$0xff]  ;;  %461 = vmatpush.bf16.msrb.mxu2 %v745_v29  ;;  %v744_v33 = vld [vmem:[#allocation5 + $0x30] sm:$0xff] }
  0x86   :  { %v107_v44 = vrot.slane %v94_v36, 1  ;;  %v141_v45 = vrot.slane %v128_v37, 2  ;;  %423 = vmatpush.bf16.msrb.mxu1 %v743_v32  ;;  %v742_v36 = vld [vmem:[#allocation5 + $0x20] sm:$0xff] }
  0x87   :  { %v113_v47 = vsel %vm105_vm1, %v111_v38, %v112_v40  ;;  %v115_v48 = vsel %vm105_vm1, %v112_v40, %v114_v26  ;;  %v147_v55 = vsel %vm139_vm2, %v145_v39, %v146_v41  ;;  %v149_v56 = vsel %vm139_vm2, %v146_v41, %v148_v30  ;;  %v739_v30 = vld [vmem:[#allocation5 + $0x8] sm:$0xff] }
  0x88   :  { %v122_v51 = vadd.f32 %v113_v47, %v78_v34  ;;  %v123_v52 = vadd.f32 %v115_v48, %v79_v43  ;;  %v108_v53 = vsel %vm105_vm1, %v106_v42, %v107_v44  ;;  %v110_v54 = vsel %vm105_vm1, %v107_v44, %v109_v24  ;;  %386 = vmatpush.bf16.msrb.mxu0 %v739_v30  ;;  %v738_v34 = vld [vmem:[#allocation5] sm:$0xff]  ;;  %v747_v42 = vld [vmem:[#allocation5 + $0x48] sm:$0xff]  ;;  %v753_v47 = vld [vmem:[#allocation5 + $0x78] sm:$0xff] }
  0x89   :  { %v120_v57 = vadd.f32 %v108_v53, %v76_v35  ;;  %v121_v58 = vadd.f32 %v110_v54, %v77_v49  ;;  %v142_v61 = vsel %vm139_vm2, %v140_v46, %v141_v45  ;;  %v144_v62 = vsel %vm139_vm2, %v141_v45, %v143_v25  ;;  %v740_v35 = vld [vmem:[#allocation5 + $0x10] sm:$0xff]  ;;  %462 = vmatpush.bf16.msrb.mxu2 %v744_v33  ;;  %v746_v48 = vld [vmem:[#allocation5 + $0x40] sm:$0xff]  ;;  %v749_v49 = vld [vmem:[#allocation5 + $0x58] sm:$0xff] }
  0x8a   :  { %v156_v59 = vadd.f32 %v147_v55, %v122_v51  ;;  %v157_v60 = vadd.f32 %v149_v56, %v123_v52  ;;  %356 = vmatpush.bf16.msra.mxu3 %v740_v35  ;;  %424 = vmatpush.bf16.msrb.mxu1 %v742_v36  ;;  %v752_v52 = vld [vmem:[#allocation5 + $0x70] sm:$0xff]  ;;  %v750_v55 = vld [vmem:[#allocation5 + $0x60] sm:$0xff] }
  0x8b   :  { %v154_v63 = vadd.f32 %v142_v61, %v120_v57  ;;  %v155_v0 = vadd.f32 %v144_v62, %v121_v58  ;;  %v748_v53 = vld [vmem:[#allocation5 + $0x50] sm:$0xff] }
  0x8c   :  { %v164_v1 = vadd.f32 %v766_v50, %v156_v59  ;;  %v165_v2 = vadd.f32 %v766_v50, %v157_v60  ;;  %387 = vmatpush.bf16.msrb.mxu0 %v738_v34 }
  0x8d   :  { %v162_v3 = vadd.f32 %v766_v50, %v154_v63  ;;  %v163_v4 = vadd.f32 %v766_v50, %v155_v0  ;;  %v751_v50 = vld [vmem:[#allocation5 + $0x68] sm:$0xff] }
  0x8e   :  { %v168_v5 = vmax.f32 %v164_v1, 0.0  ;;  %v169_v6 = vmax.f32 %v165_v2, 0.0  ;;  %499 = vmatpush.bf16.msrb.mxu3 %v747_v42 }
  0x8f   :  { %v166_v7 = vmax.f32 %v162_v3, 0.0  ;;  %v167_v8 = vmax.f32 %v163_v4, 0.0 }
  0x90   :  { %178 = vst.msk [vmem:[#allocation2 + $0x19] sm:$0xff] %vm175_vm3, %v168_v5 }
  0x91   :  { %179 = vst.msk [vmem:[#allocation2 + $0x21] sm:$0xff] %vm175_vm3, %v169_v6 }
  0x92   :  { %176 = vst.msk [vmem:[#allocation2 + $0x1] sm:$0xff] %vm175_vm3, %v166_v7  ;;  %500 = vmatpush.bf16.msrb.mxu3 %v746_v48 }
  0x93   :  { %177 = vst.msk [vmem:[#allocation2 + $0x9] sm:$0xff] %vm175_vm3, %v167_v8 }
  0x98   :  { %v182_v9 = vld [vmem:[#allocation2 + $0x18] ss:$2 sm:$0xff]  ;;  %v186_v10 = vld [vmem:[#allocation2 + $0x19] ss:$2 sm:$0xff] }
  0x99   :  { %v188_v12 = vmax.f32 %v182_v9, %v186_v10  ;;  %v192_v15 = vld [vmem:[#allocation2 + $0x1a] ss:$2 sm:$0xff] }
  0x9a   :  { %v180_v13 = vld [vmem:[#allocation2] ss:$2 sm:$0xff]  ;;  %v184_v14 = vld [vmem:[#allocation2 + $0x1] ss:$2 sm:$0xff] }
  0x9b   :  { %v187_v16 = vmax.f32 %v180_v13, %v184_v14  ;;  %v194_v17 = vmax.f32 %v188_v12, %v192_v15  ;;  %v190_v18 = vld [vmem:[#allocation2 + $0x2] ss:$2 sm:$0xff] }
  0x9d   :  { %v193_v19 = vmax.f32 %v187_v16, %v190_v18  ;;  %200 = vst.msk [vmem:[#allocation3 + $0x11] sm:$0xff] %vm175_vm3, %v194_v17 }
  0x9f   :  { %199 = vst.msk [vmem:[#allocation3 + $0x1] sm:$0xff] %vm175_vm3, %v193_v19 }
  0xa4   :  { %v207_v20 = vld [vmem:[#allocation3 + $0x11] sm:$0xff] }
  0xa5   :  { %v202_v21 = vld [vmem:[#allocation3 + $0x10] sm:$0xff] }
  0xa6   :  { %v259_v22 = vld [vmem:[#allocation3 + $0x12] sm:$0xff]  ;;  %v206_v23 = vld [vmem:[#allocation3 + $0x1] sm:$0xff] }
  0xa7   :  { %v201_v24 = vld [vmem:[#allocation3] sm:$0xff]  ;;  %v208_v26 = vpack.c.bf16 %v207_v20, %v206_v23 }
  0xa8   :  { %v258_v25 = vld [vmem:[#allocation3 + $0x2] sm:$0xff]  ;;  %v203_v27 = vpack.c.bf16 %v202_v21, %v201_v24 }
  0xa9   :  { %v260_v28 = vpack.c.bf16 %v259_v22, %v258_v25  ;;  %650 = vmatmul.msk.bf16.vlgmr.msra.gmra.mxu0 %vm175_vm3, %v208_v26 }
  0xaa   :  { %655 = vmatmul.msk.bf16.vlgmr.msra.gmra.mxu1 %vm175_vm3, %v203_v27  ;;  %537 = vmatpush.bf16.msra.mxu0 %v749_v49 }
  0xab   :  { %662 = vmatmul.msk.bf16.vlgmr.msra.gmra.mxu2 %vm175_vm3, %v260_v28  ;;  %575 = vmatpush.bf16.msra.mxu1 %v751_v50 }
  0xac   :  { %613 = vmatpush.bf16.msra.mxu2 %v753_v47 }
  0xae   :  { %538 = vmatpush.bf16.msra.mxu0 %v748_v53 }
  0xaf   :  { %576 = vmatpush.bf16.msra.mxu1 %v750_v55 }
  0xb0   :  { %614 = vmatpush.bf16.msra.mxu2 %v752_v52 }
 0x126   :  { %v230_v37 = vpop.f32.mrf.mxu0 }
 0x127   :  { %v253_v38 = vpop.f32.mrf.mxu1 }
 0x128   :  { %v254_v39 = vadd.f32 %v253_v38, %v230_v37 }
 0x12e   :  { %v282_v40 = vpop.f32.mrf.mxu2  ;;  %v232_v44 = vpop.f32.mrf.mxu0 }
 0x12f   :  { %v287_v41 = vadd.f32 %v282_v40, %v254_v39  ;;  %v255_v45 = vpop.f32.mrf.mxu1 }
 0x130   :  { %v256_v51 = vadd.f32 %v255_v45, %v232_v44 }
 0x131   :  { %v293_v43 = vadd.f32 %v767_v11, %v287_v41 }
 0x133   :  { %v295_v46 = vmax.f32 %v293_v43, 0.0 }
 0x135   :  { %303 = vst.msk [vmem:[#allocation4 + $0x1] sm:$0xff] %vm302_vm5, %v295_v46 }
 0x136   :  { %v284_v54 = vpop.f32.mrf.mxu2 }
 0x137   :  { %v288_v56 = vadd.f32 %v284_v54, %v256_v51 }
 0x139   :  { %v294_v57 = vadd.f32 %v767_v11, %v288_v56 }
 0x13b   :  { %v296_v58 = vmax.f32 %v294_v57, 0.0 }
 0x13c   :  { %v305_v59 = vld [vmem:[#allocation4] sm:$0xff] }
 0x13d   :  { %v307_v60 = vld [vmem:[#allocation4 + $0x1] sm:$0xff]  ;;  %304 = vst.msk [vmem:[#allocation4 + $0x11] sm:$0xff] %vm302_vm5, %v296_v58 }
 0x13e   :  { %v309_v61 = vmax.f32 %v305_v59, %v307_v60  ;;  %v311_v62 = vld [vmem:[#allocation4 + $0x2] sm:$0xff]  ;;  %v768_v59 = vld [vmem:[%s975_s6] ss:$0 sm:$0xff] }
 0x140   :  { %v313_v63 = vmax.f32 %v309_v61, %v311_v62 }
 0x142   :  { %v315_v0 = vpack.c.bf16 %v313_v63, %v313_v63 }
 0x144   :  { %v306_v1 = vld [vmem:[#allocation4 + $0x10] sm:$0xff]  ;;  %v328_v6 = vunpack.c.l.b16 %v315_v0 }
 0x145   :  { %v308_v2 = vld [vmem:[#allocation4 + $0x11] sm:$0xff] }
 0x146   :  { %v310_v3 = vmax.f32 %v306_v1, %v308_v2  ;;  %v312_v4 = vld [vmem:[#allocation4 + $0x12] sm:$0xff]  ;;  %v330_v9 = vrot.slane %v328_v6, 1  ;;  %v398_v10 = vrot.slane %v328_v6, 2  ;;  %v436_v12 = vrot.slane %v328_v6, 3 }
 0x147   :  { %v474_v25 = vrot.slane %v328_v6, 4  ;;  %v512_v30 = vrot.slane %v328_v6, 5  ;;  %v550_v31 = vrot.slane %v328_v6, 6  ;;  %v588_v32 = vrot.slane %v328_v6, 7 }
 0x148   :  { %v314_v5 = vmax.f32 %v310_v3, %v312_v4 }
 0x14a   :  { %v316_v7 = vpack.c.bf16 %v314_v5, %v314_v5 }
 0x14c   :  { %v329_v8 = vunpack.c.l.b16 %v316_v7 }
 0x14e   :  { %v332_v13 = vsel %vm331_vm6, %v329_v8, %v330_v9  ;;  %v362_v14 = vrot.slane %v329_v8, 7  ;;  %v399_v15 = vrot.slane %v329_v8, 1  ;;  %v437_v16 = vrot.slane %v329_v8, 2 }
 0x14f   :  { %v333_v17 = vpack.c.b16 %v332_v13, %v332_v13  ;;  %v475_v24 = vrot.slane %v329_v8, 3  ;;  %v513_v26 = vrot.slane %v329_v8, 4  ;;  %v551_v27 = vrot.slane %v329_v8, 5 }
 0x150   :  { %v363_v18 = vsel %vm331_vm6, %v362_v14, %v328_v6  ;;  %v400_v19 = vsel %vm331_vm6, %v399_v15, %v398_v10  ;;  %v438_v20 = vsel %vm331_vm6, %v437_v16, %v436_v12  ;;  %v589_v28 = vrot.slane %v329_v8, 6 }
 0x151   :  { %671 = vmatmul.msk.bf16.vlgmr.msra.gmra.mxu3 %vm302_vm5, %v333_v17  ;;  %v364_v21 = vpack.c.b16 %v363_v18, %v363_v18  ;;  %v401_v22 = vpack.c.b16 %v400_v19, %v400_v19  ;;  %v439_v23 = vpack.c.b16 %v438_v20, %v438_v20  ;;  %v476_v29 = vsel %vm331_vm6, %v475_v24, %v474_v25 }
 0x152   :  { %v514_v33 = vsel %vm331_vm6, %v513_v26, %v512_v30  ;;  %v552_v34 = vsel %vm331_vm6, %v551_v27, %v550_v31  ;;  %v477_v35 = vpack.c.b16 %v476_v29, %v476_v29  ;;  %v590_v36 = vsel %vm331_vm6, %v589_v28, %v588_v32 }
 0x153   :  { %680 = vmatmul.msk.bf16.vlgmr.msrb.gmra.mxu0 %vm302_vm5, %v364_v21  ;;  %689 = vmatmul.msk.bf16.vlgmr.msrb.gmra.mxu1 %vm302_vm5, %v401_v22  ;;  %v515_v37 = vpack.c.b16 %v514_v33, %v514_v33  ;;  %v553_v38 = vpack.c.b16 %v552_v34, %v552_v34  ;;  %v591_v39 = vpack.c.b16 %v590_v36, %v590_v36 }
 0x154   :  { %698 = vmatmul.msk.bf16.vlgmr.msrb.gmra.mxu2 %vm302_vm5, %v439_v23 }
 0x161   :  { %707 = vmatmul.msk.bf16.vlgmr.msrb.gmra.mxu3 %vm302_vm5, %v477_v35 }
 0x163   :  { %716 = vmatmul.msk.bf16.vlgmr.msra.gmra.mxu0 %vm302_vm5, %v515_v37  ;;  %725 = vmatmul.msk.bf16.vlgmr.msra.gmra.mxu1 %vm302_vm5, %v553_v38 }
 0x164   :  { %734 = vmatmul.msk.bf16.vlgmr.msra.gmra.mxu2 %vm302_vm5, %v591_v39 }
 0x1d0   :  { %v389_v11 = vpop.f32.mrf.mxu0  ;;  %v426_v40 = vpop.f32.mrf.mxu1 }
 0x1d4   :  { %v358_v41 = vpop.f32.mrf.mxu3 }
 0x1d5   :  { %v390_v45 = vadd.f32 %v389_v11, %v358_v41 }
 0x1d7   :  { %v464_v42 = vpop.f32.mrf.mxu2  ;;  %v430_v47 = vadd.f32 %v426_v40, %v390_v45 }
 0x1d8   :  { %v391_v43 = vpop.f32.mrf.mxu0  ;;  %v428_v44 = vpop.f32.mrf.mxu1 }
 0x1d9   :  { %v468_v51 = vadd.f32 %v464_v42, %v430_v47 }
 0x1dc   :  { %v360_v46 = vpop.f32.mrf.mxu3 }
 0x1df   :  { %v466_v48 = vpop.f32.mrf.mxu2 }
 0x1e0   :  { %v540_v49 = vpop.f32.mrf.mxu0  ;;  %v578_v50 = vpop.f32.mrf.mxu1 }
 0x1e4   :  { %v502_v52 = vpop.f32.mrf.mxu3 }
 0x1e5   :  { %v506_v53 = vadd.f32 %v502_v52, %v468_v51 }
 0x1e7   :  { %v544_v54 = vadd.f32 %v540_v49, %v506_v53  ;;  %v616_v55 = vpop.f32.mrf.mxu2 }
 0x1e8   :  { %v542_v56 = vpop.f32.mrf.mxu0  ;;  %v580_v57 = vpop.f32.mrf.mxu1 }
 0x1e9   :  { %v582_v58 = vadd.f32 %v578_v50, %v544_v54 }
 0x1eb   :  { %v620_v60 = vadd.f32 %v616_v55, %v582_v58 }
 0x1ec   :  { %v504_v61 = vpop.f32.mrf.mxu3 }
 0x1ed   :  { %v625_v62 = vadd.f32 %v768_v59, %v620_v60 }
 0x1ef   :  { %626 = vst [vmem:[#allocation8] sm:$0x3] %v625_v62  ;;  %v618_v63 = vpop.f32.mrf.mxu2 }
 0x1f0   :  { %637 = dma.vmem_to_hbm [thread:$0]  %s633_s10, 32, %s635_s12, [#allocation7]  }
 0x1f1   :  { %819 = dma.done.wait [#allocation7], 32  }
 0x1f2   :  { %820 = vsyncadd [#allocation7], 4294967264 }
 0x1f3   :  { %642 = vsyncpa [#allocation6], 1 }
 0x1f4   :  { %643 = vsyncpa [#allocation7], 1 }

</bundles_post_ra>
